<compile_context>
chip_gen: v7x
topology: tpu7x:2x2x1
jax: 0.10.0
libtpu: 0.0.40
codegen_flags: <defaults>
</compile_context>

<pallas_src>
import jax
import jax.numpy as jnp
from jax.experimental import pallas as pl
from jax.experimental.pallas import tpu as pltpu


def _maxpool_c2t_kernel(len_ref, x_ref, o_ref):
    # len_ref : VMEM block (TN, 1) int32
    # x_ref   : VMEM block (TN, L, D)
    # o_ref   : VMEM block (TN, D)
    x = x_ref[...]                                            # (TN, L, D)
    lengths = len_ref[...]                                    # (TN, 1)
    L = x.shape[1]

    # (1, L, 1) char-position iota; compare against (TN, 1, 1) lengths -> (TN, L, 1)
    pos = jax.lax.broadcasted_iota(jnp.int32, (1, L, 1), 1)
    mask = pos >= lengths[:, :, None]

    # torch.finfo() defaults to float32; for float32 inputs this matches exactly.
    mask_value = jnp.finfo(x.dtype).min
    masked = jnp.where(mask, mask_value, x)                   # (TN, L, D)

    # Sublane (axis=1) reduce goes through the XLU, fully hidden under the DMA.
    o_ref[...] = jnp.max(masked, axis=1)                      # (TN, D)


def _choose_tn(n, l, d, itemsize, target_block_bytes=4 << 20):
    """Tokens per block: ~4 MiB input blocks (safe for v7x's 64 MiB VMEM),
    multiple of 8 sublanes, capped at ceil8(N)."""
    per_token = l * d * itemsize
    tn = max(8, (target_block_bytes // per_token) // 8 * 8)
    n_ceil8 = (n + 7) // 8 * 8
    return int(min(tn, n_ceil8))


def maxpool_char2token(char_embeddings, token_lengths):
    """char_embeddings: [N, L, D] float32; token_lengths: any shape flattening to [N]."""
    lengths = jnp.reshape(token_lengths, (-1,)).astype(jnp.int32)
    N, L, D = char_embeddings.shape
    assert lengths.shape[0] == N

    dtype = char_embeddings.dtype
    itemsize = jnp.dtype(dtype).itemsize
    tn = _choose_tn(N, L, D, itemsize)

    # Pad the token axis so the grid tiles evenly; padded rows are sliced off.
    n_pad = pl.cdiv(N, tn) * tn
    if n_pad != N:
        char_embeddings = jnp.pad(
            char_embeddings, ((0, n_pad - N), (0, 0), (0, 0)))
        lengths = jnp.pad(lengths, (0, n_pad - N))
    lengths2d = lengths.reshape(n_pad, 1)

    grid = (n_pad // tn,)

    # TODO(synk): if D << 128 stays hot in production, present a lane-dense
    # output slab ((n_pad // k, k * D) with k * D == 128) via a wrapper reshape.
    out = pl.pallas_call(
        _maxpool_c2t_kernel,
        grid=grid,
        in_specs=[
            pl.BlockSpec((tn, 1), lambda i: (i, 0)),
            pl.BlockSpec((tn, L, D), lambda i: (i, 0, 0)),
        ],
        out_specs=pl.BlockSpec((tn, D), lambda i: (i, 0)),
        out_shape=jax.ShapeDtypeStruct((n_pad, D), dtype),
        compiler_params=pltpu.CompilerParams(
            dimension_semantics=("parallel",),
            vmem_limit_bytes=64 << 20,
        ),
    )(lengths2d, char_embeddings)

    return out[:N]


def _reference(char_embeddings, token_lengths):
    lengths = jnp.reshape(token_lengths, (-1,)).astype(jnp.int32)
    N, L, D = char_embeddings.shape
    pos = jnp.arange(L)[None, :, None]                        # (1, L, 1)
    mask = pos >= lengths[:, None, None]                      # (N, L, 1)
    mask_value = jnp.finfo(char_embeddings.dtype).min
    masked = jnp.where(mask, mask_value, char_embeddings)
    return jnp.max(masked, axis=1)


if __name__ == "__main__":
    key = jax.random.PRNGKey(0)
    k1, k2 = jax.random.split(key)

    # Case 1: 2 sentences x 4 tokens = 8 tokens, 16 chars per token, 32-dim embeddings.
    N, L, D = 8, 16, 32
    char_embeddings = jax.random.normal(k1, (N, L, D), dtype=jnp.float32)
    # deterministic lengths in [1, L], at least one == L (matches torch max(lengths)==L)
    token_lengths = jnp.array([[3, 16, 7, 1],
                               [12, 5, 9, 16]], dtype=jnp.int32)

    out = maxpool_char2token(char_embeddings, token_lengths)
    out = jax.block_until_ready(out)
    ref = _reference(char_embeddings, token_lengths)
    assert out.shape == (N, D)
    assert jnp.allclose(out, ref), "Pallas kernel mismatch vs reference (case 1)"

    # Case 2: ragged N (not a multiple of 8) to exercise the padding path.
    N2 = 13
    ce2 = jax.random.normal(k2, (N2, L, D), dtype=jnp.float32)
    lens2 = jnp.array([1, 16, 4, 9, 2, 7, 16, 3, 11, 5, 8, 14, 6], dtype=jnp.int32)
    out2 = jax.block_until_ready(maxpool_char2token(ce2, lens2))
    ref2 = _reference(ce2, lens2)
    assert out2.shape == (N2, D)
    assert jnp.allclose(out2, ref2), "Pallas kernel mismatch vs reference (case 2)"

    print("KERNEL_OK")
</pallas_src>

<mosaic_0001>
module attributes {stable_mosaic.version = 11 : i64} {
  func.func @_maxpool_c2t_kernel(%arg0: i32, %arg1: memref<8x1xi32, #tpu.memory_space<vmem>>, %arg2: memref<8x16x32xf32, #tpu.memory_space<vmem>>, %arg3: memref<8x32xf32, #tpu.memory_space<vmem>>) attributes {dimension_semantics = [#tpu.dimension_semantics<parallel>], iteration_bounds = array<i64: 1>, scalar_prefetch = 0 : i64, scratch_operands = 0 : i64, tpu.core_type = #tpu.core_type<tc>, window_params = [{transform_indices = @transform_0, window_bounds = array<i64: 8, 1>}, {transform_indices = @transform_1, window_bounds = array<i64: 8, 16, 32>}, {transform_indices = @transform_2, window_bounds = array<i64: 8, 32>}]} {
    %c0 = arith.constant 0 : index
    %c0_0 = arith.constant 0 : index
    %c0_1 = arith.constant 0 : index
    %0 = vector.load %arg2[%c0, %c0_0, %c0_1] : memref<8x16x32xf32, #tpu.memory_space<vmem>>, vector<8x16x32xf32>
    %c0_2 = arith.constant 0 : index
    %c0_3 = arith.constant 0 : index
    %1 = vector.load %arg1[%c0_2, %c0_3] : memref<8x1xi32, #tpu.memory_space<vmem>>, vector<8x1xi32>
    %2 = tpu.iota {dimensions = array<i32: 1>} : vector<1x16x1xi32>
    %3 = vector.shape_cast %1 : vector<8x1xi32> to vector<8x1x1xi32>
    %4 = vector.broadcast %2 : vector<1x16x1xi32> to vector<8x16x1xi32>
    %5 = vector.broadcast %3 : vector<8x1x1xi32> to vector<8x16x1xi32>
    %6 = arith.cmpi sge, %4, %5 : vector<8x16x1xi32>
    %cst = arith.constant -3.40282347E+38 : f32
    %7 = vector.shape_cast %6 : vector<8x16x1xi1> to vector<8x16x1xi1>
    %8 = vector.broadcast %7 : vector<8x16x1xi1> to vector<8x16x32xi1>
    %9 = vector.broadcast %cst : f32 to vector<8x16x32xf32>
    %10 = arith.select %8, %9, %0 : vector<8x16x32xi1>, vector<8x16x32xf32>
    %cst_4 = arith.constant dense<0xFF800000> : vector<8x32xf32>
    %11 = vector.multi_reduction <maximumf>, %10, %cst_4 [1] : vector<8x16x32xf32> to vector<8x32xf32>
    %c0_5 = arith.constant 0 : index
    %c0_6 = arith.constant 0 : index
    %12 = vector.load %arg3[%c0_5, %c0_6] : memref<8x32xf32, #tpu.memory_space<vmem>>, vector<8x32xf32>
    tpu.vector_store %arg3[%c0_5, %c0_6], %11 {strides = array<i32>} : memref<8x32xf32, #tpu.memory_space<vmem>>, vector<8x32xf32>,
    return
  }
  func.func @transform_0(%arg0: i32) -> (i32, i32) {
    %c0_i32 = arith.constant 0 : i32
    %c0_i32_0 = arith.constant 0 : i32
    return %arg0, %c0_i32 : i32, i32
  }
  func.func @transform_1(%arg0: i32) -> (i32, i32, i32) {
    %c0_i32 = arith.constant 0 : i32
    %c0_i32_0 = arith.constant 0 : i32
    %c0_i32_1 = arith.constant 0 : i32
    return %arg0, %c0_i32, %c0_i32_0 : i32, i32, i32
  }
  func.func @transform_2(%arg0: i32) -> (i32, i32) {
    %c0_i32 = arith.constant 0 : i32
    %c0_i32_0 = arith.constant 0 : i32
    return %arg0, %c0_i32 : i32, i32
  }
}

</mosaic_0001>

<bundles_post_ra>
// kernel: tpu_custom_call.1
= control target key start
LH: loop header
LB: loop body
LE: loop exit
PB: predicated region body
PF: predicated region fallthrough
CT: control target
= control target key end

     0   :  { %7 = vsyncpa [#allocation3], 0  ;;  %s569_s0 = inlined_call_operand.hbm [shape: s32[8,1], index: 0, kind: input, shape index: {}]   ;;  %s570_s1 = inlined_call_operand.hbm [shape: f32[8,16,32], index: 1, kind: input, shape index: {}]   ;;  %s571_s2 = inlined_call_operand.hbm [shape: f32[8,32], index: 2, kind: output, shape index: {}]  }
   0x1   :  { %8 = vsyncpa [#allocation6], 0 }
   0x2   :  { %9 = vsyncpa [#allocation4], 0  ;;  %s446_s9 = smov [#allocation2]   ;;  %s447_s11 = smov [#allocation5]  }
   0x3   :  { %s16_s10 = sshll.u32 %s446_s9, 4  ;;  %s25_s12 = sshll.u32 %s447_s11, 4  ;;  %s17_s10 = int_to_ptr.vmem [resolvable:$true] %s16_s10  ;;  %s468_s12 = int_to_ptr.vmem [resolvable:$true] %s25_s12 }
   0x4   :  { %s374_s15 = scalar_lea.hbm %s569_s0, 128 }
   0x5   :  { %p375_p0 = scmp.ne.s32.totalorder %s569_s0, %s374_s15  ;;  %p378_p1 = scmp.lt.u32.totalorder %s374_s15, %s569_s0 }
   0x7   :  { %p380_p2 = pnand %p378_p1, %p375_p0 }
   0x9   :  { %383 = shalt.err (!%p380_p2)
}
   0xa   :  { %s384_s20 = scalar_lea.vmem %s17_s10, 128  ;;  %p389_p4 = scmp.lt.s32.totalorder %s17_s10, %s17_s10 }
   0xb   :  { %p385_p3 = scmp.ne.s32.totalorder %s17_s10, %s384_s20  ;;  %p390_p5 = scmp.lt.s32.totalorder %s384_s20, %s384_s20 }
   0xd   :  { %p391_p6 = por %p390_p5, %p389_p4 }
   0xf   :  { %p392_p7 = pnand %p391_p6, %p385_p3 }
  0x11   :  { %395 = shalt.err (!%p392_p7)
}
  0x12   :  { %19 = dma.hbm_to_vmem [thread:$0]  %s569_s0, 128, %s17_s10, [#allocation3]  }
  0x13   :  { %s396_s25 = scalar_lea.hbm %s570_s1, 2048 }
  0x14   :  { %p397_p8 = scmp.ne.s32.totalorder %s570_s1, %s396_s25  ;;  %p400_p9 = scmp.lt.u32.totalorder %s396_s25, %s570_s1 }
  0x16   :  { %p402_p10 = pnand %p400_p9, %p397_p8 }
  0x18   :  { %405 = shalt.err (!%p402_p10)
}
  0x19   :  { %s406_s30 = scalar_lea.vmem %s468_s12, 2048  ;;  %p411_p12 = scmp.lt.s32.totalorder %s468_s12, %s468_s12 }
  0x1a   :  { %p407_p11 = scmp.ne.s32.totalorder %s468_s12, %s406_s30  ;;  %p412_p13 = scmp.lt.s32.totalorder %s406_s30, %s406_s30 }
  0x1c   :  { %p413_p0 = por %p412_p13, %p411_p12 }
  0x1e   :  { %p414_p1 = pnand %p413_p0, %p407_p11 }
  0x20   :  { %417 = shalt.err (!%p414_p1)
}
  0x21   :  { %s448_s0 = smov 128   ;;  %s449_s3 = smov 8  }
  0x22   :  { %31 = dma.hbm_to_vmem [thread:$0]  %s570_s1, 2048, %s468_s12, [#allocation6], %s448_s0, %s448_s0, %s449_s3  }
  0x23   :  { %440 = dma.done.wait [#allocation3], 128  }
  0x24   :  { %441 = vsyncadd [#allocation3], 4294967168 }
  0x25   :  { %442 = dma.done.wait [#allocation6], 2048  }
  0x26   :  { %443 = vsyncadd [#allocation6], 4294965248  ;;  %v55_v0 = vlaneseq  ;;  %v450_v1 = vmov 0   ;;  %v451_v2 = vmov 1966171168   ;;  %v54_v7 = vld [vmem:[#allocation2] sm:$0xff] }
  0x27   :  { %371 = vset.pattern.permute.xlu0 %v450_v1  ;;  %v60_v3 = vunpack.c.l.s4 %v451_v2  ;;  %372 = vset.pattern.permute.xlu1 %v450_v1  ;;  %v58_v10 = vcombine.high %v54_v7, %v54_v7  ;;  %v38_v49 = vld [vmem:[#allocation5] sm:$0xff]  ;;  %v39_v50 = vld [vmem:[#allocation5 + $0x8] sm:$0xff]  ;;  %v40_v52 = vld [vmem:[#allocation5 + $0x10] sm:$0xff]  ;;  %s452_s1 = smov [#allocation7]  }
  0x28   :  { %v501_v4 = vshrl.u32 %v55_v0, 7  ;;  %v41_v53 = vld [vmem:[#allocation5 + $0x18] sm:$0xff]  ;;  %v42_v58 = vld [vmem:[#allocation5 + $0x20] sm:$0xff]  ;;  %v43_v0 = vld [vmem:[#allocation5 + $0x28] sm:$0xff]  ;;  %s354_s6 = sshll.u32 %s452_s1, 4  ;;  %s355_s6 = int_to_ptr.vmem [resolvable:$true] %s354_s6 }
  0x29   :  { %v61_v5 = vunpack.c.0.s8 %v60_v3  ;;  %s418_s7 = scalar_lea.vmem %s355_s6, 128  ;;  %p423_p3 = scmp.lt.s32.totalorder %s355_s6, %s355_s6 }
  0x2a   :  { %v109_v9 = vsub.s32 0, %v501_v4  ;;  %v506_v13 = vadd.s32 8, %v501_v4  ;;  %p419_p2 = scmp.ne.s32.totalorder %s355_s6, %s418_s7  ;;  %p424_p4 = scmp.lt.s32.totalorder %s418_s7, %s418_s7 }
  0x2b   :  { %v64_v6 = vsub.s32 %v61_v5, %v501_v4 }
  0x2c   :  { %p425_p5 = por %p424_p4, %p423_p3 }
  0x2d   :  { %v65_v8 = vrot.slane %v54_v7, %v64_v6  ;;  %v72_v14 = vrot.slane %v58_v10, %v64_v6 }
  0x2e   :  { %p426_p6 = pnand %p425_p5, %p419_p2 }
  0x2f   :  { %v81_v11 = vrot.slane %v65_v8, %v64_v6  ;;  %v73_v12 = vcombine.high %v65_v8, %v65_v8  ;;  %v88_v18 = vrot.slane %v72_v14, %v64_v6  ;;  %v74_v26 = vcombine.high %v72_v14, %v72_v14  ;;  %v46_v8 = vld [vmem:[#allocation5 + $0x40] sm:$0xff] }
  0x31   :  { %v110_v15 = vrot.slane %v81_v11, %v109_v9  ;;  %v95_v16 = vrot.slane %v73_v12, %v64_v6  ;;  %v103_v17 = vcombine.high %v81_v11, %v81_v11  ;;  %v126_v24 = vrot.slane %v88_v18, %v109_v9  ;;  %v47_v11 = vld [vmem:[#allocation5 + $0x48] sm:$0xff] }
  0x32   :  { %v102_v30 = vrot.slane %v74_v26, %v64_v6  ;;  %v104_v34 = vcombine.high %v88_v18, %v88_v18 }
  0x33   :  { %vm139_vm0 = vcmp.ge.s32.totalorder %v501_v4, %v110_v15  ;;  %v114_v19 = vrot.slane %v95_v16, %v109_v9  ;;  %vm140_vm1 = vcmp.ge.s32.totalorder %v506_v13, %v110_v15  ;;  %v118_v20 = vrot.slane %v103_v17, %v109_v9 }
  0x34   :  { %v155_v21 = vsel %vm139_vm0, 1, %v450_v1  ;;  %v156_v23 = vsel %vm140_vm1, 1, %v450_v1  ;;  %v105_v25 = vcombine.high %v95_v16, %v95_v16  ;;  %vm147_vm6 = vcmp.ge.s32.totalorder %v501_v4, %v126_v24 }
  0x35   :  { %172 = vperm.xlu0 %371, %v155_v21   ;;  %vm141_vm2 = vcmp.ge.s32.totalorder %v501_v4, %v114_v19  ;;  %vm142_vm3 = vcmp.ge.s32.totalorder %v506_v13, %v114_v19  ;;  %vm143_vm4 = vcmp.ge.s32.totalorder %v501_v4, %v118_v20  ;;  %vm144_vm5 = vcmp.ge.s32.totalorder %v506_v13, %v118_v20  ;;  %v44_v20 = vld [vmem:[#allocation5 + $0x30] sm:$0xff] }
  0x36   :  { %v157_v22 = vsel %vm141_vm2, 1, %v450_v1  ;;  %v158_v27 = vsel %vm142_vm3, 1, %v450_v1  ;;  %v159_v28 = vsel %vm143_vm4, 1, %v450_v1  ;;  %v122_v29 = vrot.slane %v105_v25, %v109_v9  ;;  %v45_v25 = vld [vmem:[#allocation5 + $0x38] sm:$0xff] }
  0x37   :  { %178 = vperm.xlu1 %372, %v157_v22   ;;  %v160_v31 = vsel %vm144_vm5, 1, %v450_v1  ;;  %vm148_vm7 = vcmp.ge.s32.totalorder %v506_v13, %v126_v24  ;;  %v163_v32 = vsel %vm147_vm6, 1, %v450_v1  ;;  %v130_v33 = vrot.slane %v102_v30, %v109_v9 }
  0x38   :  { %vm145_vm8 = vcmp.ge.s32.totalorder %v501_v4, %v122_v29  ;;  %v164_v35 = vsel %vm148_vm7, 1, %v450_v1  ;;  %vm146_vm9 = vcmp.ge.s32.totalorder %v506_v13, %v122_v29  ;;  %v134_v37 = vrot.slane %v104_v34, %v109_v9 }
  0x39   :  { %175 = vperm.xlu0 %371, %v156_v23   ;;  %v161_v36 = vsel %vm145_vm8, 1, %v450_v1  ;;  %vm149_vm10 = vcmp.ge.s32.totalorder %v501_v4, %v130_v33  ;;  %v106_v38 = vcombine.high %v102_v30, %v102_v30  ;;  %v162_v39 = vsel %vm146_vm9, 1, %v450_v1 }
  0x3a   :  { %vm150_vm11 = vcmp.ge.s32.totalorder %v506_v13, %v130_v33  ;;  %v165_v40 = vsel %vm149_vm10, 1, %v450_v1  ;;  %vm151_vm12 = vcmp.ge.s32.totalorder %v501_v4, %v134_v37  ;;  %vm152_vm13 = vcmp.ge.s32.totalorder %v506_v13, %v134_v37  ;;  %v49_v37 = vld [vmem:[#allocation5 + $0x58] sm:$0xff] }
  0x3b   :  { %181 = vperm.xlu1 %372, %v158_v27   ;;  %v138_v41 = vrot.slane %v106_v38, %v109_v9  ;;  %v166_v42 = vsel %vm150_vm11, 1, %v450_v1  ;;  %v167_v43 = vsel %vm151_vm12, 1, %v450_v1  ;;  %v168_v44 = vsel %vm152_vm13, 1, %v450_v1 }
  0x3c   :  { %vm251_vm3 = vcmask 261120  }
  0x3d   :  { %184 = vperm.xlu0 %371, %v159_v28   ;;  %vm153_vm14 = vcmp.ge.s32.totalorder %v501_v4, %v138_v41  ;;  %vm154_vm15 = vcmp.ge.s32.totalorder %v506_v13, %v138_v41  ;;  %v50_v41 = vld [vmem:[#allocation5 + $0x60] sm:$0xff] }
  0x3e   :  { %v169_v45 = vsel %vm153_vm14, 1, %v450_v1  ;;  %v170_v46 = vsel %vm154_vm15, 1, %v450_v1 }
  0x3f   :  { %187 = vperm.xlu1 %372, %v160_v31   ;;  %v48_v31 = vld [vmem:[#allocation5 + $0x50] sm:$0xff] }
  0x41   :  { %196 = vperm.xlu0 %371, %v163_v32  }
  0x43   :  { %199 = vperm.xlu1 %372, %v164_v35  }
  0x45   :  { %190 = vperm.xlu0 %371, %v161_v36  }
  0x47   :  { %193 = vperm.xlu1 %372, %v162_v39  }
  0x49   :  { %202 = vperm.xlu0 %371, %v165_v40  }
  0x4b   :  { %205 = vperm.xlu1 %372, %v166_v42  }
  0x4d   :  { %208 = vperm.xlu0 %371, %v167_v43  }
  0x4f   :  { %211 = vperm.xlu1 %372, %v168_v44  }
  0x51   :  { %214 = vperm.xlu0 %371, %v169_v45  }
  0x53   :  { %217 = vperm.xlu1 %372, %v170_v46  }
  0xb4   :  { %v173_v47 = vpop.permute.xlu0 %172 }
  0xb5   :  { %vm219_vm0 = vcmp.eq.s32.totalorder %v173_v47, 1  ;;  %v51_v47 = vld [vmem:[#allocation5 + $0x68] sm:$0xff] }
  0xb6   :  { %v179_v48 = vpop.permute.xlu1 %178  ;;  %v235_v54 = vsel %vm219_vm0, -3.4028235e+38, %v38_v49 }
  0xb7   :  { %vm221_vm1 = vcmp.eq.s32.totalorder %v179_v48, 1  ;;  %v252_v62 = vsel %vm251_vm3, %v235_v54, -inf }
  0xb8   :  { %v176_v51 = vpop.permute.xlu0 %175  ;;  %v237_v59 = vsel %vm221_vm1, -3.4028235e+38, %v40_v52  ;;  %vm332_vm1 = vcmask 1041409  }
  0xb9   :  { %vm220_vm2 = vcmp.eq.s32.totalorder %v176_v51, 1  ;;  %v261_v4 = vsel %vm251_vm3, %v237_v59, -inf }
  0xba   :  { %v236_v55 = vsel %vm220_vm2, -3.4028235e+38, %v39_v50  ;;  %v182_v56 = vpop.permute.xlu1 %181  ;;  %vm334_vm2 = vcmask 1042434  }
  0xbb   :  { %v253_v57 = vsel %vm251_vm3, %v236_v55, -inf  ;;  %vm222_vm4 = vcmp.eq.s32.totalorder %v182_v56, 1  ;;  %v52_v56 = vld [vmem:[#allocation5 + $0x70] sm:$0xff] }
  0xbc   :  { %v238_v60 = vsel %vm222_vm4, -3.4028235e+38, %v41_v53  ;;  %v185_v61 = vpop.permute.xlu0 %184  ;;  %v254_v1 = vmax.f32 %v252_v62, %v253_v57  ;;  %vm336_vm4 = vcmask 1043459  }
  0xbd   :  { %v262_v63 = vsel %vm251_vm3, %v238_v60, -inf  ;;  %vm223_vm5 = vcmp.eq.s32.totalorder %v185_v61, 1 }
  0xbe   :  { %v239_v2 = vsel %vm223_vm5, -3.4028235e+38, %v42_v58  ;;  %v188_v3 = vpop.permute.xlu1 %187  ;;  %v263_v5 = vmax.f32 %v261_v4, %v262_v63  ;;  %v255_v12 = vrot.slane %v254_v1, 4  ;;  %vm338_vm5 = vcmask 1044484  }
  0xbf   :  { %vm224_vm6 = vcmp.eq.s32.totalorder %v188_v3, 1  ;;  %v270_v9 = vsel %vm251_vm3, %v239_v2, -inf }
  0xc0   :  { %v240_v6 = vsel %vm224_vm6, -3.4028235e+38, %v43_v0  ;;  %v197_v7 = vpop.permute.xlu0 %196  ;;  %v264_v16 = vrot.slane %v263_v5, 4  ;;  %v256_v22 = vmax.f32 %v254_v1, %v255_v12  ;;  %v53_v1 = vld [vmem:[#allocation5 + $0x78] sm:$0xff]  ;;  %vm340_vm6 = vcmask 1045509  }
  0xc1   :  { %v271_v10 = vsel %vm251_vm3, %v240_v6, -inf  ;;  %vm227_vm7 = vcmp.eq.s32.totalorder %v197_v7, 1 }
  0xc2   :  { %v272_v13 = vmax.f32 %v270_v9, %v271_v10  ;;  %v200_v14 = vpop.permute.xlu1 %199  ;;  %v243_v15 = vsel %vm227_vm7, -3.4028235e+38, %v46_v8  ;;  %v265_v28 = vmax.f32 %v263_v5, %v264_v16  ;;  %v257_v33 = vrot.slane %v256_v22, 2 }
  0xc3   :  { %vm228_vm8 = vcmp.eq.s32.totalorder %v200_v14, 1  ;;  %v288_v23 = vsel %vm251_vm3, %v243_v15, -inf  ;;  %vm342_vm7 = vcmask 1046534  }
  0xc4   :  { %v273_v17 = vrot.slane %v272_v13, 4  ;;  %v244_v18 = vsel %vm228_vm8, -3.4028235e+38, %v47_v11  ;;  %v191_v19 = vpop.permute.xlu0 %190  ;;  %v266_v42 = vrot.slane %v265_v28, 2  ;;  %v258_v48 = vmax.f32 %v256_v22, %v257_v33 }
  0xc5   :  { %v289_v21 = vsel %vm251_vm3, %v244_v18, -inf  ;;  %vm225_vm9 = vcmp.eq.s32.totalorder %v191_v19, 1  ;;  %vm344_vm8 = vcmask 1047559  }
  0xc6   :  { %v194_v24 = vpop.permute.xlu1 %193  ;;  %v290_v26 = vmax.f32 %v288_v23, %v289_v21  ;;  %v241_v27 = vsel %vm225_vm9, -3.4028235e+38, %v44_v20  ;;  %v274_v29 = vmax.f32 %v272_v13, %v273_v17  ;;  %v267_v57 = vmax.f32 %v265_v28, %v266_v42 }
  0xc7   :  { %vm226_vm10 = vcmp.eq.s32.totalorder %v194_v24, 1  ;;  %v279_v34 = vsel %vm251_vm3, %v241_v27, -inf  ;;  %v259_v8 = vrot.slane %v258_v48, 1 }
  0xc8   :  { %v203_v30 = vpop.permute.xlu0 %202  ;;  %v242_v32 = vsel %vm226_vm10, -3.4028235e+38, %v45_v25  ;;  %v291_v38 = vrot.slane %v290_v26, 4  ;;  %v275_v43 = vrot.slane %v274_v29, 2  ;;  %v268_v9 = vrot.slane %v267_v57, 1 }
  0xc9   :  { %vm229_vm11 = vcmp.eq.s32.totalorder %v203_v30, 1  ;;  %v280_v35 = vsel %vm251_vm3, %v242_v32, -inf  ;;  %v260_v24 = vmax.f32 %v258_v48, %v259_v8 }
  0xca   :  { %v206_v36 = vpop.permute.xlu1 %205  ;;  %v281_v39 = vmax.f32 %v279_v34, %v280_v35  ;;  %v245_v40 = vsel %vm229_vm11, -3.4028235e+38, %v48_v31  ;;  %v292_v53 = vmax.f32 %v290_v26, %v291_v38  ;;  %v276_v58 = vmax.f32 %v274_v29, %v275_v43 }
  0xcb   :  { %vm230_vm12 = vcmp.eq.s32.totalorder %v206_v36, 1  ;;  %v297_v49 = vsel %vm251_vm3, %v245_v40, -inf  ;;  %v269_v21 = vmax.f32 %v267_v57, %v268_v9 }
  0xcc   :  { %v209_v44 = vpop.permute.xlu0 %208  ;;  %v282_v45 = vrot.slane %v281_v39, 4  ;;  %v246_v46 = vsel %vm230_vm12, -3.4028235e+38, %v49_v37  ;;  %v293_v5 = vrot.slane %v292_v53, 2  ;;  %v277_v12 = vrot.slane %v276_v58, 1 }
  0xcd   :  { %vm231_vm13 = vcmp.eq.s32.totalorder %v209_v44, 1  ;;  %v298_v50 = vsel %vm251_vm3, %v246_v46, -inf  ;;  %v333_v31 = vsel %vm332_vm1, %v269_v21, %v260_v24 }
  0xce   :  { %v247_v51 = vsel %vm231_vm13, -3.4028235e+38, %v50_v41  ;;  %v212_v52 = vpop.permute.xlu1 %211  ;;  %v283_v54 = vmax.f32 %v281_v39, %v282_v45  ;;  %v299_v55 = vmax.f32 %v297_v49, %v298_v50  ;;  %v294_v19 = vmax.f32 %v292_v53, %v293_v5 }
  0xcf   :  { %vm232_vm14 = vcmp.eq.s32.totalorder %v212_v52, 1  ;;  %v306_v59 = vsel %vm251_vm3, %v247_v51, -inf  ;;  %v278_v25 = vmax.f32 %v276_v58, %v277_v12 }
  0xd0   :  { %v248_v60 = vsel %vm232_vm14, -3.4028235e+38, %v51_v47  ;;  %v215_v61 = vpop.permute.xlu0 %214  ;;  %v284_v62 = vrot.slane %v283_v54, 2  ;;  %v300_v63 = vrot.slane %v299_v55, 4  ;;  %v295_v30 = vrot.slane %v294_v19, 1 }
  0xd1   :  { %v307_v0 = vsel %vm251_vm3, %v248_v60, -inf  ;;  %vm233_vm15 = vcmp.eq.s32.totalorder %v215_v61, 1  ;;  %v335_v34 = vsel %vm334_vm2, %v278_v25, %v333_v31 }
  0xd2   :  { %v308_v2 = vmax.f32 %v306_v59, %v307_v0  ;;  %v249_v3 = vsel %vm233_vm15, -3.4028235e+38, %v52_v56  ;;  %v218_v4 = vpop.permute.xlu1 %217  ;;  %v285_v6 = vmax.f32 %v283_v54, %v284_v62  ;;  %v301_v7 = vmax.f32 %v299_v55, %v300_v63 }
  0xd3   :  { %vm234_vm0 = vcmp.eq.s32.totalorder %v218_v4, 1  ;;  %v315_v14 = vsel %vm251_vm3, %v249_v3, -inf  ;;  %v296_v38 = vmax.f32 %v294_v19, %v295_v30 }
  0xd4   :  { %v309_v10 = vrot.slane %v308_v2, 4  ;;  %v250_v11 = vsel %vm234_vm0, -3.4028235e+38, %v53_v1  ;;  %v302_v13 = vrot.slane %v301_v7, 2  ;;  %v286_v16 = vrot.slane %v285_v6, 1 }
  0xd5   :  { %v316_v15 = vsel %vm251_vm3, %v250_v11, -inf }
  0xd6   :  { %v310_v17 = vmax.f32 %v308_v2, %v309_v10  ;;  %v317_v18 = vmax.f32 %v315_v14, %v316_v15  ;;  %v303_v20 = vmax.f32 %v301_v7, %v302_v13  ;;  %v287_v26 = vmax.f32 %v285_v6, %v286_v16 }
  0xd8   :  { %v311_v22 = vrot.slane %v310_v17, 2  ;;  %v318_v23 = vrot.slane %v317_v18, 4  ;;  %v304_v27 = vrot.slane %v303_v20, 1  ;;  %v337_v37 = vsel %vm336_vm4, %v287_v26, %v335_v34 }
  0xd9   :  { %v339_v41 = vsel %vm338_vm5, %v296_v38, %v337_v37 }
  0xda   :  { %v312_v28 = vmax.f32 %v310_v17, %v311_v22  ;;  %v319_v29 = vmax.f32 %v317_v18, %v318_v23  ;;  %v305_v35 = vmax.f32 %v303_v20, %v304_v27 }
  0xdc   :  { %v313_v32 = vrot.slane %v312_v28, 1  ;;  %v320_v33 = vrot.slane %v319_v29, 2  ;;  %v341_v43 = vsel %vm340_vm6, %v305_v35, %v339_v41 }
  0xde   :  { %v321_v36 = vmax.f32 %v319_v29, %v320_v33  ;;  %v314_v39 = vmax.f32 %v312_v28, %v313_v32 }
  0xe0   :  { %v322_v40 = vrot.slane %v321_v36, 1  ;;  %v343_v44 = vsel %vm342_vm7, %v314_v39, %v341_v43 }
  0xe2   :  { %v323_v42 = vmax.f32 %v321_v36, %v322_v40 }
  0xe4   :  { %v345_v45 = vsel %vm344_vm8, %v323_v42, %v343_v44 }
  0xe5   :  { %347 = vst.msk [vmem:[#allocation7] sm:$0xff] %vm251_vm3, %v345_v45 }
  0xe6   :  { %429 = shalt.err (!%p426_p6)
}
  0xe7   :  { %s430_s10 = scalar_lea.hbm %s571_s2, 128 }
  0xe8   :  { %p431_p7 = scmp.ne.s32.totalorder %s571_s2, %s430_s10  ;;  %p434_p8 = scmp.lt.u32.totalorder %s430_s10, %s571_s2 }
  0xea   :  { %p436_p9 = pnand %p434_p8, %p431_p7 }
  0xec   :  { %439 = shalt.err (!%p436_p9)
}
  0xed   :  { %357 = dma.vmem_to_hbm [thread:$0]  %s355_s6, 128, %s571_s2, [#allocation4]  }
  0xee   :  { %444 = dma.done.wait [#allocation4], 128  }
  0xef   :  { %445 = vsyncadd [#allocation4], 4294967168 }
  0xf0   :  { %361 = vsyncpa [#allocation3], 1 }
  0xf1   :  { %362 = vsyncpa [#allocation6], 1 }
  0xf2   :  { %363 = vsyncpa [#allocation4], 1 }

</bundles_post_ra>
